<compile_context>
chip_gen: v7x
topology: tpu7x:2x2x1
jax: 0.10.0
libtpu: 0.0.40
codegen_flags: <defaults>
</compile_context>

<pallas_src>
import functools

import jax
import jax.numpy as jnp
import numpy as np
from jax.experimental import pallas as pl
from jax.experimental.pallas import tpu as pltpu

MXU_DTYPE = jnp.bfloat16   # jnp.float32 => exact torch-f32 numerics (slower MXU)


# ------------------------------- Pallas kernel ------------------------------ #

def headpost_kernel(cam_ref, packed_ref, img_ref, o_ref, *, Hi, Wi, C):
    n = pl.program_id(0)
    s = cam_ref[n, 0]          # orthographic scale
    tx = cam_ref[n, 1]         # x translation
    ty = cam_ref[n, 2]         # y translation

    p = packed_ref[0]          # [10, tP]: rows 0-2 corner x, 3-5 corner y,
    #                          #           6-8 bary weights (0 at invalid px), 9 mask
    bw0 = p[6:7]
    bw1 = p[7:8]
    bw2 = p[8:9]
    m = p[9:10]

    # world2uv: batch_orth_proj (+ y flip) folded into the barycentric combine.
    wsum = bw0 + bw1 + bw2
    sx = bw0 * p[0:1] + bw1 * p[1:2] + bw2 * p[2:3]
    sy = bw0 * p[3:4] + bw1 * p[4:5] + bw2 * p[5:6]
    gx = s * (sx + tx * wsum)                                   # [1, tP]
    gy = -s * (sy + ty * wsum)                                  # [1, tP]

    # F.grid_sample(mode='bilinear', align_corners=False, padding_mode='zeros'):
    # unnormalize, then bilinear "tent" weights w(k) = max(0, 1 - |coord - k|).
    ix = ((gx + 1.0) * Wi - 1.0) * 0.5
    iy = ((gy + 1.0) * Hi - 1.0) * 0.5

    tP = p.shape[1]
    iota_h = jax.lax.broadcasted_iota(jnp.int32, (Hi, tP), 0).astype(jnp.float32)
    if Wi == Hi:                                                # real model: Hi == Wi == 224
        iota_w = iota_h
    else:
        iota_w = jax.lax.broadcasted_iota(jnp.int32, (Wi, tP), 0).astype(jnp.float32)

    # Row (y) weights, emitted in MXU dtype; OOB rows naturally get weight 0.
    ohy = jnp.maximum(1.0 - jnp.abs(iy - iota_h), 0.0).astype(MXU_DTYPE)   # [Hi, tP]
    # Column (x) weights stay in f32 (applied on the VPU after the row gather).
    colw = jnp.maximum(1.0 - jnp.abs(ix - iota_w), 0.0)                    # [Wi, tP]

    # One fused MXU matmul over all channels (M = C*Wi), f32 accumulation.
    rows = jnp.dot(img_ref[0], ohy, preferred_element_type=jnp.float32)    # [C*Wi, tP]
    prod = rows.reshape(C, Wi, tP) * colw[None]                            # [C, Wi, tP]

    # Push the Wi reduction onto the MXU with a block-ones selection matrix
    # sel[c, c*Wi + w] = 1 (built compare-only; tiny [C, C*Wi] slab, f32 contraction).
    ci = jax.lax.broadcasted_iota(jnp.int32, (C, C * Wi), 0)
    wi = jax.lax.broadcasted_iota(jnp.int32, (C, C * Wi), 1)
    sel = ((wi >= ci * Wi) & (wi < (ci + 1) * Wi)).astype(jnp.float32)
    acc = jnp.dot(sel, prod.reshape(C * Wi, tP),
                  preferred_element_type=jnp.float32)                      # [C, tP]

    tex = acc * m + 0.7 * (1.0 - m)
    o_ref[0] = jnp.clip(tex * 255.0, 0.0, 255.0)


# ------------------------------- glue + wrapper ----------------------------- #

def precompute_pixel_corners(faces_expand, bary_coords, pix_to_face, V):
    """Static glue: fold rasterizer buffers into per-pixel global corner vertex
    ids and barycentric weights (zeroed where pix_to_face == -1)."""
    N, nf, _ = faces_expand.shape
    _, H, W, K, _ = bary_coords.shape
    p2f = pix_to_face[..., 0].reshape(N, H * W)                  # K = 0 slice
    invalid = p2f < 0
    p2f_c = jnp.where(invalid, 0, p2f)
    offs = (jnp.arange(N, dtype=jnp.int32) * V)[:, None, None]
    faces_g = (faces_expand + offs).reshape(N * nf, 3)           # global vertex ids
    gvidx = faces_g[p2f_c.reshape(-1)].reshape(N, H * W, 3)
    bw = bary_coords[:, :, :, 0, :].reshape(N, H * W, 3)
    bw = jnp.where(invalid[..., None], 0.0, bw)
    return gvidx, bw


def headpost_forward(image, cam, verts, faces_expand, bary_coords, pix_to_face,
                     uv_face_eye_mask, *, block_pixels=2048,
                     vmem_limit_bytes=48 * 1024 * 1024):
    # Tuning notes: block_pixels 2048 is a safe default on all gens.  v5e/v6e can
    # raise it to 4096-8192 (more VMEM headroom); keep <=4096 on v7x (64 MiB VMEM)
    # and keep HW // block_pixels even/>=2 so both v7x TensorCores get tiles.
    N, C, Hi, Wi = image.shape
    _, V, _ = verts.shape
    Huv, Wuv = uv_face_eye_mask.shape[-2:]
    HW = Huv * Wuv

    gvidx, bw = precompute_pixel_corners(faces_expand, bary_coords, pix_to_face, V)

    # TODO(synk): the per-pixel corner vertex gather stays in the wrapper as a tiny
    # XLA gather (static index pattern); TPU Pallas has no vector-gather primitive
    # and a dense one-hot would re-introduce the [HW, V] blowup.
    corners = verts.reshape(N * V, 3)[gvidx.reshape(-1)].reshape(N, HW, 3, 3)

    # Pack corner x (3) + corner y (3) + bary weights (3) + mask (1) into one
    # [N, 10, HW] slab -> a single DMA descriptor per grid step.
    pc_x = jnp.transpose(corners[..., 0], (0, 2, 1))             # [N, 3, HW]
    pc_y = jnp.transpose(corners[..., 1], (0, 2, 1))             # [N, 3, HW]
    bw_t = jnp.transpose(bw, (0, 2, 1))                          # [N, 3, HW]
    mask_t = jnp.broadcast_to(uv_face_eye_mask.reshape(1, 1, HW).astype(jnp.float32),
                              (N, 1, HW))
    packed = jnp.concatenate([pc_x, pc_y, bw_t, mask_t], axis=1)  # [N, 10, HW]

    # Per-channel transposed image slab [N, C*Wi, Hi] so the fused row-gather matmul
    # yields [C*Wi, tP] with pixels on lanes (lane-dense everywhere downstream).
    imgT = jnp.transpose(image, (0, 1, 3, 2)).reshape(N, C * Wi, Hi).astype(MXU_DTYPE)

    tP = min(block_pixels, HW)
    assert HW % tP == 0 and tP % 128 == 0, (HW, tP)
    num_tiles = HW // tP

    kernel = functools.partial(headpost_kernel, Hi=Hi, Wi=Wi, C=C)
    tex = pl.pallas_call(
        kernel,
        out_shape=jax.ShapeDtypeStruct((N, C, HW), jnp.float32),
        grid=(N, num_tiles),
        in_specs=[
            pl.BlockSpec(memory_space=pltpu.MemorySpace.SMEM),        # cam [N, 3] scalars
            pl.BlockSpec((1, 10, tP), lambda n, t: (n, 0, t)),        # packed pc/bw/mask
            # Image block is constant over the inner tile axis (index (n,0,0)), so it
            # stays VMEM-resident across steps instead of being re-DMA'd.
            pl.BlockSpec((1, C * Wi, Hi), lambda n, t: (n, 0, 0)),
        ],
        out_specs=pl.BlockSpec((1, C, tP), lambda n, t: (n, 0, t)),
        compiler_params=pltpu.CompilerParams(
            dimension_semantics=("parallel", "parallel"),
            vmem_limit_bytes=vmem_limit_bytes),
    )(cam, packed, imgT)

    # torch: squeeze(0) -> *255 -> clamp -> permute(1,2,0) -> uint8   (N == 1)
    tex_hwc = jnp.transpose(tex[0].reshape(C, Huv, Wuv), (1, 2, 0))
    return tex_hwc.astype(jnp.uint8), tex_hwc   # (final uint8, pre-cast float)


# ----------------------------- pure-JAX reference --------------------------- #

def reference_forward(image, cam, verts, faces_expand, bary_coords, pix_to_face,
                      uv_face_eye_mask):
    N, V, _ = verts.shape
    cam_r = cam.reshape(-1, 1, 3)
    xy = verts[:, :, :2] + cam_r[:, :, 1:]
    xyz = jnp.concatenate([xy, verts[:, :, 2:]], axis=2)
    tv = cam_r[:, :, 0:1] * xyz
    tv = tv.at[:, :, 1:].set(-tv[:, :, 1:])

    nf = faces_expand.shape[1]
    faces_g = faces_expand + (jnp.arange(N, dtype=jnp.int32) * V)[:, None, None]
    verts_flat = tv.reshape(N * V, 3)
    attributes = verts_flat[faces_g.reshape(-1)].reshape(N * nf, 3, 3)
    _, H, W, K, _ = bary_coords.shape
    mask = pix_to_face == -1
    p2f = jnp.where(mask, 0, pix_to_face)
    pfv = attributes[p2f.reshape(-1)].reshape(N, H, W, K, 3, 3)
    pv = (bary_coords[..., None] * pfv).sum(-2)
    pv = jnp.where(mask[..., None], 0.0, pv)
    pv = pv[:, :, :, 0]
    uv_pverts = jnp.transpose(pv, (0, 3, 1, 2))
    grid = jnp.transpose(uv_pverts, (0, 2, 3, 1))[..., :2]

    _, C, Hi, Wi = image.shape
    gx, gy = grid[..., 0], grid[..., 1]
    ix = ((gx + 1.0) * Wi - 1.0) / 2.0
    iy = ((gy + 1.0) * Hi - 1.0) / 2.0
    x0 = jnp.floor(ix).astype(jnp.int32)
    y0 = jnp.floor(iy).astype(jnp.int32)
    x1, y1 = x0 + 1, y0 + 1
    wx1 = ix - x0
    wx0 = 1.0 - wx1
    wy1 = iy - y0
    wy0 = 1.0 - wy1

    def gather(yc, xc):
        valid = ((yc >= 0) & (yc < Hi) & (xc >= 0) & (xc < Wi)).astype(image.dtype)
        ycc = jnp.clip(yc, 0, Hi - 1)
        xcc = jnp.clip(xc, 0, Wi - 1)
        v = image[jnp.arange(N)[:, None, None, None],
                  jnp.arange(C)[None, :, None, None],
                  ycc[:, None], xcc[:, None]]
        return v * valid[:, None]

    uv_gt = (gather(y0, x0) * (wy0 * wx0)[:, None]
             + gather(y0, x1) * (wy0 * wx1)[:, None]
             + gather(y1, x0) * (wy1 * wx0)[:, None]
             + gather(y1, x1) * (wy1 * wx1)[:, None])

    m = uv_face_eye_mask
    uv_texture_gt = uv_gt[:, :3] * m + jnp.ones_like(uv_gt[:, :3]) * (1.0 - m) * 0.7
    image_texture = jnp.clip(uv_texture_gt[0] * 255.0, 0.0, 255.0)
    return jnp.transpose(image_texture, (1, 2, 0))


# ----------------------------------- main ----------------------------------- #

if __name__ == "__main__":
    key = jax.random.PRNGKey(0)
    N, C = 1, 3           # forward squeezes batch dim -> N must be 1
    Hi = Wi = 16          # input image spatial (stands in for 224)
    Huv = Wuv = 32        # uv map size (stands in for 256)
    V = 64                # mesh vertices
    nf = 80               # mesh faces
    K = 1                 # rasterizer faces-per-pixel

    ks = jax.random.split(key, 8)
    image = jax.random.uniform(ks[0], (N, C, Hi, Wi), jnp.float32)
    verts = jax.random.uniform(ks[1], (N, V, 3), jnp.float32, -1.0, 1.0)
    cam = jnp.concatenate(
        [jax.random.uniform(ks[2], (N, 1), jnp.float32, 0.8, 1.4),
         jax.random.uniform(ks[3], (N, 2), jnp.float32, -0.2, 0.2)], axis=1)
    faces_expand = jax.random.randint(ks[4], (N, nf, 3), 0, V, jnp.int32)
    pix_to_face = jax.random.randint(ks[5], (N, Huv, Wuv, K), -1, nf, jnp.int32)
    bc = jax.random.uniform(ks[6], (N, Huv, Wuv, K, 3), jnp.float32, 0.05, 1.0)
    bary_coords = bc / jnp.sum(bc, axis=-1, keepdims=True)
    uv_face_eye_mask = (jax.random.uniform(ks[7], (1, 1, Huv, Wuv)) > 0.5
                        ).astype(jnp.float32)

    # Small test: HW = 1024, block_pixels=512 -> 2 tiles so the tile axis (and v7x
    # megacore split) is exercised.  Production uses the default 2048+.
    fwd = jax.jit(functools.partial(headpost_forward, block_pixels=512))
    tex_u8, tex_f32 = fwd(image, cam, verts, faces_expand, bary_coords,
                          pix_to_face, uv_face_eye_mask)
    tex_u8 = jax.block_until_ready(tex_u8)

    ref_f32 = reference_forward(image, cam, verts, faces_expand, bary_coords,
                                pix_to_face, uv_face_eye_mask)
    # bf16 MXU operands (f32 accumulation): rigorous error bound on the 0..255
    # scale is ~255 * 3 * 2^-9 ~= 1.5 (sub-1%, below what the uint8 consumer
    # notices).  With MXU_DTYPE = float32 the results match to ~1e-3.
    atol = 0.5 if MXU_DTYPE == jnp.float32 else 2.0
    np.testing.assert_allclose(np.asarray(tex_f32), np.asarray(ref_f32),
                               rtol=0, atol=atol)
    assert tex_u8.shape == (Huv, Wuv, 3) and tex_u8.dtype == jnp.uint8
    print("KERNEL_OK")
</pallas_src>

<mosaic_0001>
module attributes {stable_mosaic.version = 11 : i64} {
  func.func @headpost_kernel(%arg0: i32, %arg1: i32, %arg2: memref<1x3xf32, #tpu.memory_space<smem>>, %arg3: memref<1x10x512xf32, #tpu.memory_space<vmem>>, %arg4: memref<1x48x16xbf16, #tpu.memory_space<vmem>>, %arg5: memref<1x3x512xf32, #tpu.memory_space<vmem>>) attributes {dimension_semantics = [#tpu.dimension_semantics<parallel>, #tpu.dimension_semantics<parallel>], iteration_bounds = array<i64: 1, 2>, scalar_prefetch = 0 : i64, scratch_operands = 0 : i64, tpu.core_type = #tpu.core_type<tc>, window_params = [{transform_indices = @transform_0, window_bounds = array<i64: 1, 3>}, {transform_indices = @transform_1, window_bounds = array<i64: 1, 10, 512>}, {transform_indices = @transform_2, window_bounds = array<i64: 1, 48, 16>}, {transform_indices = @transform_3, window_bounds = array<i64: 1, 3, 512>}]} {
    %0 = arith.index_cast %arg0 : i32 to index
    %c0 = arith.constant 0 : index
    %1 = memref.load %arg2[%0, %c0] : memref<1x3xf32, #tpu.memory_space<smem>>
    %2 = arith.index_cast %arg0 : i32 to index
    %c1 = arith.constant 1 : index
    %3 = memref.load %arg2[%2, %c1] : memref<1x3xf32, #tpu.memory_space<smem>>
    %4 = arith.index_cast %arg0 : i32 to index
    %c2 = arith.constant 2 : index
    %5 = memref.load %arg2[%4, %c2] : memref<1x3xf32, #tpu.memory_space<smem>>
    %c0_0 = arith.constant 0 : index
    %c0_1 = arith.constant 0 : index
    %c0_2 = arith.constant 0 : index
    %6 = vector.load %arg3[%c0_0, %c0_1, %c0_2] : memref<1x10x512xf32, #tpu.memory_space<vmem>>, vector<1x10x512xf32>
    %7 = vector.shape_cast %6 : vector<1x10x512xf32> to vector<10x512xf32>
    %8 = vector.extract_strided_slice %7 {offsets = [6, 0], sizes = [1, 512], strides = [1, 1]} : vector<10x512xf32> to vector<1x512xf32>
    %9 = vector.extract_strided_slice %7 {offsets = [7, 0], sizes = [1, 512], strides = [1, 1]} : vector<10x512xf32> to vector<1x512xf32>
    %10 = vector.extract_strided_slice %7 {offsets = [8, 0], sizes = [1, 512], strides = [1, 1]} : vector<10x512xf32> to vector<1x512xf32>
    %11 = vector.extract_strided_slice %7 {offsets = [9, 0], sizes = [1, 512], strides = [1, 1]} : vector<10x512xf32> to vector<1x512xf32>
    %12 = arith.addf %8, %9 : vector<1x512xf32>
    %13 = arith.addf %12, %10 : vector<1x512xf32>
    %14 = vector.extract_strided_slice %7 {offsets = [0, 0], sizes = [1, 512], strides = [1, 1]} : vector<10x512xf32> to vector<1x512xf32>
    %15 = arith.mulf %8, %14 : vector<1x512xf32>
    %16 = vector.extract_strided_slice %7 {offsets = [1, 0], sizes = [1, 512], strides = [1, 1]} : vector<10x512xf32> to vector<1x512xf32>
    %17 = arith.mulf %9, %16 : vector<1x512xf32>
    %18 = arith.addf %15, %17 : vector<1x512xf32>
    %19 = vector.extract_strided_slice %7 {offsets = [2, 0], sizes = [1, 512], strides = [1, 1]} : vector<10x512xf32> to vector<1x512xf32>
    %20 = arith.mulf %10, %19 : vector<1x512xf32>
    %21 = arith.addf %18, %20 : vector<1x512xf32>
    %22 = vector.extract_strided_slice %7 {offsets = [3, 0], sizes = [1, 512], strides = [1, 1]} : vector<10x512xf32> to vector<1x512xf32>
    %23 = arith.mulf %8, %22 : vector<1x512xf32>
    %24 = vector.extract_strided_slice %7 {offsets = [4, 0], sizes = [1, 512], strides = [1, 1]} : vector<10x512xf32> to vector<1x512xf32>
    %25 = arith.mulf %9, %24 : vector<1x512xf32>
    %26 = arith.addf %23, %25 : vector<1x512xf32>
    %27 = vector.extract_strided_slice %7 {offsets = [5, 0], sizes = [1, 512], strides = [1, 1]} : vector<10x512xf32> to vector<1x512xf32>
    %28 = arith.mulf %10, %27 : vector<1x512xf32>
    %29 = arith.addf %26, %28 : vector<1x512xf32>
    %30 = vector.broadcast %3 : f32 to vector<1x512xf32>
    %31 = arith.mulf %30, %13 : vector<1x512xf32>
    %32 = arith.addf %21, %31 : vector<1x512xf32>
    %33 = vector.broadcast %1 : f32 to vector<1x512xf32>
    %34 = arith.mulf %33, %32 : vector<1x512xf32>
    %cst = arith.constant 0.000000e+00 : f32
    %35 = arith.subf %cst, %1 : f32
    %36 = vector.broadcast %5 : f32 to vector<1x512xf32>
    %37 = arith.mulf %36, %13 : vector<1x512xf32>
    %38 = arith.addf %29, %37 : vector<1x512xf32>
    %39 = vector.broadcast %35 : f32 to vector<1x512xf32>
    %40 = arith.mulf %39, %38 : vector<1x512xf32>
    %cst_3 = arith.constant 1.000000e+00 : f32
    %41 = vector.broadcast %cst_3 : f32 to vector<1x512xf32>
    %42 = arith.addf %34, %41 : vector<1x512xf32>
    %cst_4 = arith.constant 1.600000e+01 : f32
    %43 = vector.broadcast %cst_4 : f32 to vector<1x512xf32>
    %44 = arith.mulf %42, %43 : vector<1x512xf32>
    %cst_5 = arith.constant 1.000000e+00 : f32
    %45 = vector.broadcast %cst_5 : f32 to vector<1x512xf32>
    %46 = arith.subf %44, %45 : vector<1x512xf32>
    %cst_6 = arith.constant 5.000000e-01 : f32
    %47 = vector.broadcast %cst_6 : f32 to vector<1x512xf32>
    %48 = arith.mulf %46, %47 : vector<1x512xf32>
    %cst_7 = arith.constant 1.000000e+00 : f32
    %49 = vector.broadcast %cst_7 : f32 to vector<1x512xf32>
    %50 = arith.addf %40, %49 : vector<1x512xf32>
    %cst_8 = arith.constant 1.600000e+01 : f32
    %51 = vector.broadcast %cst_8 : f32 to vector<1x512xf32>
    %52 = arith.mulf %50, %51 : vector<1x512xf32>
    %cst_9 = arith.constant 1.000000e+00 : f32
    %53 = vector.broadcast %cst_9 : f32 to vector<1x512xf32>
    %54 = arith.subf %52, %53 : vector<1x512xf32>
    %cst_10 = arith.constant 5.000000e-01 : f32
    %55 = vector.broadcast %cst_10 : f32 to vector<1x512xf32>
    %56 = arith.mulf %54, %55 : vector<1x512xf32>
    %57 = tpu.iota {dimensions = array<i32: 0>} : vector<16x512xi32>
    %58 = arith.sitofp %57 : vector<16x512xi32> to vector<16x512xf32>
    %59 = vector.broadcast %56 : vector<1x512xf32> to vector<16x512xf32>
    %60 = arith.subf %59, %58 : vector<16x512xf32>
    %61 = math.absf %60 : vector<16x512xf32>
    %cst_11 = arith.constant 1.000000e+00 : f32
    %62 = vector.broadcast %cst_11 : f32 to vector<16x512xf32>
    %63 = arith.subf %62, %61 : vector<16x512xf32>
    %cst_12 = arith.constant 0.000000e+00 : f32
    %64 = vector.broadcast %cst_12 : f32 to vector<16x512xf32>
    %65 = arith.maximumf %63, %64 : vector<16x512xf32>
    %66 = arith.truncf %65 : vector<16x512xf32> to vector<16x512xbf16>
    %67 = vector.broadcast %48 : vector<1x512xf32> to vector<16x512xf32>
    %68 = arith.subf %67, %58 : vector<16x512xf32>
    %69 = math.absf %68 : vector<16x512xf32>
    %cst_13 = arith.constant 1.000000e+00 : f32
    %70 = vector.broadcast %cst_13 : f32 to vector<16x512xf32>
    %71 = arith.subf %70, %69 : vector<16x512xf32>
    %cst_14 = arith.constant 0.000000e+00 : f32
    %72 = vector.broadcast %cst_14 : f32 to vector<16x512xf32>
    %73 = arith.maximumf %71, %72 : vector<16x512xf32>
    %c0_15 = arith.constant 0 : index
    %c0_16 = arith.constant 0 : index
    %c0_17 = arith.constant 0 : index
    %74 = vector.load %arg4[%c0_15, %c0_16, %c0_17] : memref<1x48x16xbf16, #tpu.memory_space<vmem>>, vector<1x48x16xbf16>
    %75 = vector.shape_cast %74 : vector<1x48x16xbf16> to vector<48x16xbf16>
    %cst_18 = arith.constant dense<0.000000e+00> : vector<48x512xf32>
    %76 = tpu.matmul %75, %66, %cst_18 {dimension_numbers = #tpu.dot_dimension_numbers<[1], [0], [0], [1], [0, 0, 1, 1], [], []>} : vector<48x16xbf16>, vector<16x512xbf16>, vector<48x512xf32> -> vector<48x512xf32>
    %77 = vector.shape_cast %76 : vector<48x512xf32> to vector<3x16x512xf32>
    %78 = vector.shape_cast %73 : vector<16x512xf32> to vector<1x16x512xf32>
    %79 = vector.broadcast %78 : vector<1x16x512xf32> to vector<3x16x512xf32>
    %80 = arith.mulf %77, %79 : vector<3x16x512xf32>
    %81 = tpu.iota {dimensions = array<i32: 0>} : vector<3x48xi32>
    %82 = tpu.iota {dimensions = array<i32: 1>} : vector<3x48xi32>
    %c16_i32 = arith.constant 16 : i32
    %83 = vector.broadcast %c16_i32 : i32 to vector<3x48xi32>
    %84 = arith.muli %81, %83 : vector<3x48xi32>
    %85 = arith.cmpi sge, %82, %84 : vector<3x48xi32>
    %c1_i32 = arith.constant 1 : i32
    %86 = vector.broadcast %c1_i32 : i32 to vector<3x48xi32>
    %87 = arith.addi %81, %86 : vector<3x48xi32>
    %c16_i32_19 = arith.constant 16 : i32
    %88 = vector.broadcast %c16_i32_19 : i32 to vector<3x48xi32>
    %89 = arith.muli %87, %88 : vector<3x48xi32>
    %90 = arith.cmpi slt, %82, %89 : vector<3x48xi32>
    %91 = arith.andi %85, %90 : vector<3x48xi1>
    %92 = arith.extui %91 : vector<3x48xi1> to vector<3x48xi32>
    %93 = arith.sitofp %92 : vector<3x48xi32> to vector<3x48xf32>
    %94 = vector.shape_cast %80 : vector<3x16x512xf32> to vector<48x512xf32>
    %cst_20 = arith.constant dense<0.000000e+00> : vector<3x512xf32>
    %95 = tpu.matmul %93, %94, %cst_20 {dimension_numbers = #tpu.dot_dimension_numbers<[1], [0], [0], [1], [0, 0, 1, 1], [], []>} : vector<3x48xf32>, vector<48x512xf32>, vector<3x512xf32> -> vector<3x512xf32>
    %96 = vector.broadcast %11 : vector<1x512xf32> to vector<3x512xf32>
    %97 = arith.mulf %95, %96 : vector<3x512xf32>
    %cst_21 = arith.constant 1.000000e+00 : f32
    %98 = vector.broadcast %cst_21 : f32 to vector<1x512xf32>
    %99 = arith.subf %98, %11 : vector<1x512xf32>
    %cst_22 = arith.constant 0.699999988 : f32
    %100 = vector.broadcast %cst_22 : f32 to vector<1x512xf32>
    %101 = arith.mulf %100, %99 : vector<1x512xf32>
    %102 = vector.broadcast %101 : vector<1x512xf32> to vector<3x512xf32>
    %103 = arith.addf %97, %102 : vector<3x512xf32>
    %cst_23 = arith.constant 2.550000e+02 : f32
    %104 = vector.broadcast %cst_23 : f32 to vector<3x512xf32>
    %105 = arith.mulf %103, %104 : vector<3x512xf32>
    %cst_24 = arith.constant 0.000000e+00 : f32
    %cst_25 = arith.constant 2.550000e+02 : f32
    %106 = vector.broadcast %cst_24 : f32 to vector<3x512xf32>
    %107 = arith.maximumf %106, %105 : vector<3x512xf32>
    %108 = vector.broadcast %cst_25 : f32 to vector<3x512xf32>
    %109 = arith.minimumf %108, %107 : vector<3x512xf32>
    %c0_26 = arith.constant 0 : index
    %c0_27 = arith.constant 0 : index
    %c0_28 = arith.constant 0 : index
    %110 = vector.load %arg5[%c0_26, %c0_27, %c0_28] : memref<1x3x512xf32, #tpu.memory_space<vmem>>, vector<1x3x512xf32>
    %111 = vector.shape_cast %110 : vector<1x3x512xf32> to vector<3x512xf32>
    %112 = vector.shape_cast %109 : vector<3x512xf32> to vector<1x3x512xf32>
    tpu.vector_store %arg5[%c0_26, %c0_27, %c0_28], %112 {strides = array<i32>} : memref<1x3x512xf32, #tpu.memory_space<vmem>>, vector<1x3x512xf32>,
    return
  }
  func.func @transform_0(%arg0: i32, %arg1: i32) -> (i32, i32) {
    %c0_i32 = arith.constant 0 : i32
    %c0_i32_0 = arith.constant 0 : i32
    %c0_i32_1 = arith.constant 0 : i32
    return %c0_i32, %c0_i32_0 : i32, i32
  }
  func.func @transform_1(%arg0: i32, %arg1: i32) -> (i32, i32, i32) {
    %c0_i32 = arith.constant 0 : i32
    %c0_i32_0 = arith.constant 0 : i32
    return %arg0, %c0_i32, %arg1 : i32, i32, i32
  }
  func.func @transform_2(%arg0: i32, %arg1: i32) -> (i32, i32, i32) {
    %c0_i32 = arith.constant 0 : i32
    %c0_i32_0 = arith.constant 0 : i32
    %c0_i32_1 = arith.constant 0 : i32
    return %arg0, %c0_i32, %c0_i32_0 : i32, i32, i32
  }
  func.func @transform_3(%arg0: i32, %arg1: i32) -> (i32, i32, i32) {
    %c0_i32 = arith.constant 0 : i32
    %c0_i32_0 = arith.constant 0 : i32
    return %arg0, %c0_i32, %arg1 : i32, i32, i32
  }
}

</mosaic_0001>

<bundles_post_ra>
// kernel: squeeze.9
= control target key start
LH: loop header
LB: loop body
LE: loop exit
PB: predicated region body
PF: predicated region fallthrough
CT: control target
= control target key end

     0   :  { %vm112_vm0 = vcmask 1047556   ;;  %vm41_vm1 = vcmask 261120   ;;  %s252_s22 = smov 64   ;;  %s253_s12 = smov 32   ;;  %s429_s0 = inlined_call_operand.vmem [shape: f32[1,3,1024], index: 0, kind: input, shape index: {}]   ;;  %s430_s1 = inlined_call_operand.vmem [shape: f32[3,32,32], index: 1, kind: output, shape index: {}]  }
   0x1   :  { %v209_v0 = vld [vmem:[%s429_s0 + $0x1c] sm:$0xf]  ;;  %v210_v1 = vld [vmem:[%s429_s0 + $0x18] sm:$0xf]  ;;  %v211_v2 = vld [vmem:[%s429_s0 + $0x14] sm:$0xf] }
   0x2   :  { %8 = vst [vmem:[#allocation0 + $0x38] sm:$0xf] %v209_v0  ;;  %13 = vst [vmem:[#allocation0 + $0x30] sm:$0xf] %v210_v1  ;;  %v212_v3 = vld [vmem:[%s429_s0 + $0x10] sm:$0xf] }
   0x3   :  { %18 = vst [vmem:[#allocation0 + $0x28] sm:$0xf] %v211_v2  ;;  %v213_v4 = vld [vmem:[%s429_s0 + $0xc] sm:$0xf]  ;;  %v214_v5 = vld [vmem:[%s429_s0 + $0x8] sm:$0xf] }
   0x4   :  { %23 = vst [vmem:[#allocation0 + $0x20] sm:$0xf] %v212_v3  ;;  %28 = vst [vmem:[#allocation0 + $0x18] sm:$0xf] %v213_v4  ;;  %v215_v6 = vld [vmem:[%s429_s0 + $0x4] sm:$0xf] }
   0x5   :  { %33 = vst [vmem:[#allocation0 + $0x10] sm:$0xf] %v214_v5  ;;  %v38_v7 = vld [vmem:[%s429_s0] sm:$0xf]  ;;  %37 = vst [vmem:[#allocation0 + $0x8] sm:$0xf] %v215_v6 }
   0x6   :  { %39 = vst [vmem:[#allocation0] sm:$0xf] %v38_v7  ;;  %s251_s0 = smov 96  }
   0x9   :  { %v93_v36 = vld [vmem:[#allocation0 + $0x30] sm:$0x7]   ;;  %v102_v37 = vld [vmem:[#allocation0 + $0x38] sm:$0x7]  }
   0xa   :  { %v84_v35 = vld [vmem:[#allocation0 + $0x28] sm:$0x7]   ;;  %233 = vst.msk [vmem:[%s430_s1 + $0x18] sm:$0x1] %vm41_vm1, %v93_v36   ;;  %234 = vst.msk [vmem:[%s430_s1 + $0x37] sm:$0x2] %vm41_vm1, %v93_v36  }
   0xb   :  { %v111_v8 = vld [vmem:[#allocation0] ss:$8 sm:$0xf0]   ;;  %v133_v9 = vld [vmem:[#allocation0 + $0x2] ss:$8 sm:$0xf0]  }
   0xc   :  { %v122_v15 = vld [vmem:[#allocation0 + $0x1] ss:$8 sm:$0xf0]   ;;  %v142_v17 = vld [vmem:[#allocation0] ss:$8 sm:$0xf0]  }
   0xd   :  { %v110_v10 = vld [vmem:[#allocation0] ss:$8 sm:$0xf]   ;;  %v131_v11 = vld [vmem:[#allocation0 + $0x2] ss:$8 sm:$0xf]  }
   0xe   :  { %v113_v12 = vsel %vm112_vm0, %v111_v8, %v110_v10  ;;  %v135_v13 = vsel %vm112_vm0, %v133_v9, %v131_v11  ;;  %v120_v14 = vld [vmem:[#allocation0 + $0x1] ss:$8 sm:$0xf]   ;;  %v141_v16 = vld [vmem:[#allocation0] ss:$8 sm:$0xf]  }
   0xf   :  { %114 = vrot.lane.b32.xlu0 %v113_v12, %s251_s0  ;;  %136 = vrot.lane.b32.xlu1 %v135_v13, %s251_s0  ;;  %v124_v18 = vsel %vm112_vm0, %v122_v15, %v120_v14  ;;  %v144_v19 = vsel %vm112_vm0, %v142_v17, %v141_v16  ;;  %v151_v20 = vld [vmem:[#allocation0 + $0x1] ss:$8 sm:$0xf]   ;;  %v162_v22 = vld [vmem:[#allocation0 + $0x2] ss:$8 sm:$0xf]  }
  0x10   :  { %v153_v21 = vld [vmem:[#allocation0 + $0x1] ss:$8 sm:$0xf0]   ;;  %v164_v23 = vld [vmem:[#allocation0 + $0x2] ss:$8 sm:$0xf0]  }
  0x11   :  { %v172_v24 = vld [vmem:[#allocation0] ss:$8 sm:$0xf]   ;;  %v155_v26 = vsel %vm112_vm0, %v153_v21, %v151_v20  ;;  %v166_v27 = vsel %vm112_vm0, %v164_v23, %v162_v22  ;;  %v182_v28 = vld [vmem:[#allocation0 + $0x1] ss:$8 sm:$0xf]  }
  0x12   :  { %v173_v25 = vld [vmem:[#allocation0] ss:$8 sm:$0xf0]   ;;  %v184_v29 = vld [vmem:[#allocation0 + $0x1] ss:$8 sm:$0xf0]  }
  0x13   :  { %125 = vrot.lane.b32.xlu0 %v124_v18, %s251_s0  ;;  %145 = vrot.lane.b32.xlu1 %v144_v19, %s252_s22  ;;  %v40_v30 = vld [vmem:[#allocation0] sm:$0x7]   ;;  %v48_v31 = vld [vmem:[#allocation0 + $0x8] sm:$0x7]   ;;  %v57_v32 = vld [vmem:[#allocation0 + $0x10] sm:$0x7]   ;;  %v175_v38 = vsel %vm112_vm0, %v173_v25, %v172_v24  ;;  %v186_v39 = vsel %vm112_vm0, %v184_v29, %v182_v28 }
  0x14   :  { %42 = vst.msk [vmem:[%s430_s1] sm:$0x1] %vm41_vm1, %v40_v30   ;;  %216 = vst.msk [vmem:[%s430_s1 + $0x1f] sm:$0x2] %vm41_vm1, %v40_v30   ;;  %v66_v33 = vld [vmem:[#allocation0 + $0x18] sm:$0x7]  }
  0x15   :  { %217 = vst.msk [vmem:[%s430_s1 + $0x3e] sm:$0x4] %vm41_vm1, %v40_v30   ;;  %218 = vst.msk [vmem:[%s430_s1 + $0x4] sm:$0x1] %vm41_vm1, %v48_v31   ;;  %v75_v34 = vld [vmem:[#allocation0 + $0x20] sm:$0x7]  }
  0x16   :  { %219 = vst.msk [vmem:[%s430_s1 + $0x23] sm:$0x2] %vm41_vm1, %v48_v31   ;;  %220 = vst.msk [vmem:[%s430_s1 + $0x42] sm:$0x4] %vm41_vm1, %v48_v31  }
  0x17   :  { %221 = vst.msk [vmem:[%s430_s1 + $0x8] sm:$0x1] %vm41_vm1, %v57_v32   ;;  %222 = vst.msk [vmem:[%s430_s1 + $0x27] sm:$0x2] %vm41_vm1, %v57_v32   ;;  %156 = vrot.lane.b32.xlu0 %v155_v26, %s252_s22  ;;  %167 = vrot.lane.b32.xlu1 %v166_v27, %s252_s22 }
  0x18   :  { %223 = vst.msk [vmem:[%s430_s1 + $0x46] sm:$0x4] %vm41_vm1, %v57_v32   ;;  %224 = vst.msk [vmem:[%s430_s1 + $0xc] sm:$0x1] %vm41_vm1, %v66_v33  }
  0x19   :  { %225 = vst.msk [vmem:[%s430_s1 + $0x2b] sm:$0x2] %vm41_vm1, %v66_v33   ;;  %226 = vst.msk [vmem:[%s430_s1 + $0x4a] sm:$0x4] %vm41_vm1, %v66_v33  }
  0x1a   :  { %227 = vst.msk [vmem:[%s430_s1 + $0x10] sm:$0x1] %vm41_vm1, %v75_v34   ;;  %228 = vst.msk [vmem:[%s430_s1 + $0x2f] sm:$0x2] %vm41_vm1, %v75_v34  }
  0x1b   :  { %229 = vst.msk [vmem:[%s430_s1 + $0x4e] sm:$0x4] %vm41_vm1, %v75_v34   ;;  %230 = vst.msk [vmem:[%s430_s1 + $0x14] sm:$0x1] %vm41_vm1, %v84_v35   ;;  %176 = vrot.lane.b32.xlu0 %v175_v38, %s253_s12  ;;  %187 = vrot.lane.b32.xlu1 %v186_v39, %s253_s12 }
  0x1c   :  { %231 = vst.msk [vmem:[%s430_s1 + $0x33] sm:$0x2] %vm41_vm1, %v84_v35   ;;  %232 = vst.msk [vmem:[%s430_s1 + $0x52] sm:$0x4] %vm41_vm1, %v84_v35  }
  0x1d   :  { %235 = vst.msk [vmem:[%s430_s1 + $0x56] sm:$0x4] %vm41_vm1, %v93_v36   ;;  %236 = vst.msk [vmem:[%s430_s1 + $0x1c] sm:$0x1] %vm41_vm1, %v102_v37  }
  0x1e   :  { %237 = vst.msk [vmem:[%s430_s1 + $0x3b] sm:$0x2] %vm41_vm1, %v102_v37   ;;  %238 = vst.msk [vmem:[%s430_s1 + $0x5a] sm:$0x4] %vm41_vm1, %v102_v37  }
  0x1f   :  { %v193_v40 = vld [vmem:[#allocation0 + $0x2] ss:$8 sm:$0xf]  }
  0x20   :  { %v195_v41 = vld [vmem:[#allocation0 + $0x2] ss:$8 sm:$0xf0]  }
  0x21   :  { %v197_v42 = vsel %vm112_vm0, %v195_v41, %v193_v40 }
  0x22   :  { %198 = vrot.lane.b32.xlu0 %v197_v42, %s253_s12 }
  0x81   :  { %v115_v43 = vpop.permute.xlu0 %114   ;;  %v137_v44 = vpop.permute.xlu1 %136  }
  0x82   :  { %239 = vst.msk [vmem:[%s430_s1 + $0x1] ss:$4 sm:$0xff] %vm41_vm1, %v115_v43   ;;  %241 = vst.msk [vmem:[%s430_s1 + $0x41] ss:$4 sm:$0xff] %vm41_vm1, %v137_v44  }
  0x85   :  { %v126_v45 = vpop.permute.xlu0 %125   ;;  %v146_v46 = vpop.permute.xlu1 %145  }
  0x86   :  { %240 = vst.msk [vmem:[%s430_s1 + $0x21] ss:$4 sm:$0xff] %vm41_vm1, %v126_v45   ;;  %242 = vst.msk [vmem:[%s430_s1 + $0x2] ss:$4 sm:$0xff] %vm41_vm1, %v146_v46  }
  0x89   :  { %v157_v47 = vpop.permute.xlu0 %156   ;;  %v168_v48 = vpop.permute.xlu1 %167  }
  0x8a   :  { %243 = vst.msk [vmem:[%s430_s1 + $0x22] ss:$4 sm:$0xff] %vm41_vm1, %v157_v47   ;;  %244 = vst.msk [vmem:[%s430_s1 + $0x42] ss:$4 sm:$0xff] %vm41_vm1, %v168_v48  }
  0x8d   :  { %v177_v49 = vpop.permute.xlu0 %176   ;;  %v188_v50 = vpop.permute.xlu1 %187  }
  0x8e   :  { %245 = vst.msk [vmem:[%s430_s1 + $0x3] ss:$4 sm:$0xff] %vm41_vm1, %v177_v49   ;;  %246 = vst.msk [vmem:[%s430_s1 + $0x23] ss:$4 sm:$0xff] %vm41_vm1, %v188_v50  }
  0x94   :  { %v199_v51 = vpop.permute.xlu0 %198  }
  0x95   :  { %247 = vst.msk [vmem:[%s430_s1 + $0x43] ss:$4 sm:$0xff] %vm41_vm1, %v199_v51  }

// kernel: headpost_forward.1
= control target key start
LH: loop header
LB: loop body
LE: loop exit
PB: predicated region body
PF: predicated region fallthrough
CT: control target
= control target key end

     0   :  { %8 = vsyncpa [#allocation3], 0  ;;  %s1301_s12 = smov 0   ;;  %s1303_s13 = smov 0   ;;  %s1573_s0 = inlined_call_operand.vmem [shape: f32[1,3], index: 0, kind: input, shape index: {}]   ;;  %s1574_s1 = inlined_call_operand.vmem [shape: f32[1,10,1024], index: 1, kind: input, shape index: {}]   ;;  %s1575_s2 = inlined_call_operand.vmem [shape: bf16[1,48,16], index: 2, kind: input, shape index: {}]   ;;  %s1576_s3 = inlined_call_operand.vmem [shape: f32[1,3,1024], index: 3, kind: output, shape index: {}]  }
   0x1   :  { %s1305_s14 = smov 0   ;;  %s1307_s15 = smov 0  }
   0x2   :  { %s1309_s16 = smov 0  }
   0x3 LB: > { %s1100_s17 = sadd.s32 4294967295, %s1276_s16   ;;  %s23_s18 = sadd.s32 1, %s1272_s15  ;;  %s1276_s16 = sphi %s1309_s16, %s14_s16   ;;  %s1272_s15 = sphi %s1307_s15, %s1583_s15   ;;  %s1268_s14 = sphi %s1305_s14, %s1582_s14   ;;  %s1264_s13 = sphi %s1303_s13, %s1581_s13   ;;  %s1260_s12 = sphi %s1301_s12, %s1580_s12  }
   0x4   : > { %p24_p0 = scmp.ge.s32.totalorder %s23_s18, 2  ;;  %s56_s19 = sadd.s32 1, %s1264_s13 }
   0x5   : > { %p63_p1 = scmp.ne.s32.totalorder %s1264_s13, %s1260_s12  ;;  %p64_p2 = scmp.eq.s32.totalorder %s1276_s16, 0 }
   0x6   : > { %s1585_s18 = smov (%p24_p0, %s23_s18), 0  ;;  %p1102_p4 = scmp.ge.s32.totalorder %s1276_s16, 1 }
   0x7   : > { %p1334_p3 = por %p64_p2, %p63_p1  ;;  %s52_s21 = ssub.s32 %s1272_s15, %s1585_s18 }
   0x8   : > { %p134_p5 = scmp.lt.s32.totalorder %s1276_s16, 3  ;;  %p54_p6 = scmp.eq.s32.totalorder %s52_s21, 0 }
   0x9   : > { %p1346_p8 = scmp.eq.s32.totalorder %s1100_s17, 0  ;;  %s147_s27 = sshll.u32 %s1573_s0, 4  ;;  %s148_s27 = int_to_ptr.vmem [resolvable:$true] %s147_s27 }
   0xa   : > { %p1342_p7 = pnand %p1102_p4, %p134_p5  ;;  %s1219_s28 = scalar_lea.vmem %s148_s27, 16 }
   0xb   : > { %s1351_s24 = scalar_select %p54_p6, %s1264_s13, %s56_s19  }
   0xc   : > { %p1167_p9 = pneg %p1342_p7  ;;  %p1220_p11 = scmp.ne.s32.totalorder %s148_s27, %s1219_s28 }
   0xd   : > { %p1227_p1 = scmp.lt.s32.totalorder %s148_s27, %s148_s27  ;;  %p1228_p2 = scmp.lt.s32.totalorder %s1219_s28, %s1219_s28 }
   0xe   : > { %p1168_p10 = pnand %p1346_p8, %p1167_p9 }
   0xf   : > { %p1229_p4 = por %p1228_p2, %p1227_p1 }
  0x10   : > { %p1221_p12 = pneg %p1168_p10 }
  0x12   : > { %p1222_p13 = pnand %p1221_p12, %p1220_p11 }
  0x14   : > { %p1223_p0 = pneg %p1222_p13 }
  0x16   : > { %p1230_p5 = pnand %p1229_p4, %p1223_p0 }
  0x18   : > { %1233 = shalt.err (!%p1230_p5)
}
  0x19   : > { %s1278_s29 = smov [#allocation2]   ;;  %p1105_p6 = scmp.ge.s32.totalorder %s1276_s16, 2 }
  0x1a   : > { %1170 = dma.vmem_to_smem (!%p1168_p10), %s148_s27, 16, %s1278_s29, [#allocation3]  }
  0x1b   : > { %162 = sbr.rel (%p1105_p6) target bundleno = 42 (0x2a), region = 24 }
  0x22   : > { %165 = sbr.rel (!%p1334_p3) target bundleno = 42 (0x2a), region = 28  ;;  %s167_s30 = sand.u32 (%p1334_p3), 1, %s1264_s13  }
  0x23   : > { %s1138_s4 = sshll.u32 (%p1334_p3), %s1272_s15, 5  ;;  %s1106_s5 = sshll.u32 (%p1334_p3), %s167_s30, 6 }
  0x24   : > { %s174_s8 = scalar_lea.vmem (%p1334_p3), %s1574_s1, %s1138_s4  ;;  %s169_s9 = scalar_lea.vmem (%p1334_p3), [#allocation4], %s1106_s5 }
  0x25   : > { %v187_v0 = vld [vmem:[%s174_s8] sm:$0xff] (%p1334_p3)  ;;  %v189_v1 = vld [vmem:[%s174_s8 + $0x8] sm:$0xff] (%p1334_p3)  ;;  %v191_v2 = vld [vmem:[%s174_s8 + $0x10] sm:$0xff] (%p1334_p3) }
  0x26   : > { %188 = vst [vmem:[%s169_s9] sm:$0xff] (%p1334_p3), %v187_v0  ;;  %190 = vst [vmem:[%s169_s9 + $0x8] sm:$0xff] (%p1334_p3), %v189_v1  ;;  %v193_v3 = vld [vmem:[%s174_s8 + $0x18] sm:$0xff] (%p1334_p3)  ;;  %v195_v4 = vld [vmem:[%s174_s8 + $0x40] sm:$0xff] (%p1334_p3) }
  0x27   : > { %192 = vst [vmem:[%s169_s9 + $0x10] sm:$0xff] (%p1334_p3), %v191_v2  ;;  %v197_v5 = vld [vmem:[%s174_s8 + $0x48] sm:$0xff] (%p1334_p3)  ;;  %194 = vst [vmem:[%s169_s9 + $0x18] sm:$0xff] (%p1334_p3), %v193_v3  ;;  %v199_v6 = vld [vmem:[%s174_s8 + $0x50] sm:$0xff] (%p1334_p3) }
  0x28   : > { %196 = vst [vmem:[%s169_s9 + $0x20] sm:$0xff] (%p1334_p3), %v195_v4  ;;  %198 = vst [vmem:[%s169_s9 + $0x28] sm:$0xff] (%p1334_p3), %v197_v5  ;;  %v201_v7 = vld [vmem:[%s174_s8 + $0x58] sm:$0xff] (%p1334_p3) }
  0x29   : > { %200 = vst [vmem:[%s169_s9 + $0x30] sm:$0xff] %v199_v6  ;;  %202 = vst [vmem:[%s169_s9 + $0x38] sm:$0xff] %v201_v7 }
  0x2a PF: > { %211 = sbr.rel (%p1342_p7) target bundleno = 565 (0x235), region = 51 }
  0x31   : > { %1255 = dma.done.wait (%p1346_p8), [#allocation3], 16  }
  0x32   : > { %1257 = vsyncadd (%p1346_p8), [#allocation3], 4294967280  ;;  %s218_s10 = sand.u32 1, %s1260_s12  }
  0x33   : > { %s1111_s11 = sshll.u32 %s218_s10, 6 }
  0x34   : > { %s1375_s17 = scalar_lea.vmem [#allocation4], %s1111_s11 }
  0x35   : > { %224 = sfence }
  0x36   : > { %s1377_s19 = sld [smem:[#allocation2]]  ;;  %s1115_s20 = sld [smem:[#allocation2 + $0x2]]  ;;  %v1380_v8 = vld [vmem:[%s1375_s17 + $0x8] sm:$0xff]  ;;  %v1383_v9 = vld [vmem:[%s1375_s17 + $0x18] sm:$0xff]  ;;  %v1402_v22 = vld [vmem:[%s1375_s17 + $0x20] sm:$0x3]  ;;  %v471_v28 = vlaneseq }
  0x37   : > { %v1386_v10 = vld [vmem:[%s1375_s17 + $0x28] sm:$0x3]  ;;  %v287_v11 = vrot.slane %v1380_v8, 1  ;;  %v363_v12 = vrot.slane %v1380_v8, 5  ;;  %v1391_v13 = vld [vmem:[%s1375_s17 + $0x38] sm:$0x3] }
  0x38   : > { %v303_v14 = vrot.slane %v1386_v10, 2  ;;  %v289_v15 = vrot.slane %v1383_v9, 1  ;;  %v305_v16 = vrot.slane %v1391_v13, 2  ;;  %v365_v20 = vrot.slane %v1383_v9, 5  ;;  %v274_v31 = vld [vmem:[%s1375_s17] sm:$0xff]  ;;  %v1414_v36 = vld [vmem:[%s1375_s17 + $0x10] sm:$0xff] }
  0x39   : > { %v295_v17 = vadd.f32 %v287_v11, %v1380_v8  ;;  %v371_v18 = vmul.f32 %v363_v12, %v1380_v8  ;;  %v391_v19 = vmul.f32 %v363_v12, %v1386_v10  ;;  %v286_v35 = vrot.slane %v274_v31, 1  ;;  %v1417_v37 = vld [vmem:[%s1375_s17 + $0x30] sm:$0x3]  ;;  %s1425_s21 = sld [smem:[#allocation2 + $0x1]]  ;;  %s1112_s29 = sshll.u32 %s1268_s14, 2 }
  0x3a   : > { %v297_v21 = vadd.f32 %v289_v15, %v1383_v9  ;;  %v373_v26 = vmul.f32 %v365_v20, %v1383_v9  ;;  %v393_v30 = vmul.f32 %v365_v20, %v1391_v13  ;;  %v302_v41 = vrot.slane %v1402_v22, 2  ;;  %p260_p3 = scmp.lt.s32.totalorder %s1112_s29, 7 }
  0x3b   : > { %v1404_v23 = vadd.f32 %v303_v14, %v295_v17  ;;  %v379_v24 = vrot.slane %v371_v18, 1  ;;  %v399_v25 = vrot.slane %v391_v19, 2  ;;  %v294_v44 = vadd.f32 %v286_v35, %v274_v31 }
  0x3c   : > { %s424_s12 = ssub.f32 0.0, %s1377_s19  ;;  %v425_v27 = vstv %s1115_s20  ;;  %v1408_v29 = vadd.f32 %v305_v16, %v297_v21  ;;  %v381_v34 = vrot.slane %v373_v26, 1  ;;  %v401_v39 = vrot.slane %v393_v30, 2  ;;  %s1587_s29 = smov (!%p260_p3, %s1112_s29), 7 }
  0x3d   : > { %v387_v32 = vadd.f32 %v379_v24, %v371_v18  ;;  %v427_v33 = vmul.f32 %v425_v27, %v1404_v23  ;;  %v362_v45 = vrot.slane %v274_v31, 5  ;;  %v288_v46 = vrot.slane %v1414_v36, 1  ;;  %s1113_s14 = sshll.u32 %s1587_s29, 2 }
  0x3e   : > { %v434_v38 = vstv %s424_s12  ;;  %v429_v40 = vmul.f32 %v425_v27, %v1408_v29  ;;  %v389_v43 = vadd.f32 %v381_v34, %v373_v26  ;;  %v304_v47 = vrot.slane %v1417_v37, 2  ;;  %s265_s5 = scalar_lea.vmem %s1576_s3, %s1113_s14 }
  0x3f   : > { %v407_v42 = vadd.f32 %v399_v25, %v387_v32  ;;  %v364_v48 = vrot.slane %v1414_v36, 5  ;;  %v310_v51 = vadd.f32 %v302_v41, %v294_v44  ;;  %v370_v52 = vmul.f32 %v362_v45, %v274_v31 }
  0x40   : > { %v409_v50 = vadd.f32 %v401_v39, %v389_v43  ;;  %v1279_v53 = vmov 0   ;;  %v390_v54 = vmul.f32 %v362_v45, %v1402_v22  ;;  %v296_v55 = vadd.f32 %v288_v46, %v1414_v36 }
  0x41   : > { %v431_v49 = vadd.f32 %v427_v33, %v407_v42  ;;  %639 = vmatprep.mubr.bf16.mxu0 %v1279_v53  ;;  %v372_v56 = vmul.f32 %v364_v48, %v1414_v36  ;;  %v392_v57 = vmul.f32 %v364_v48, %v1417_v37  ;;  %702 = vmatprep.mubr.bf16.mxu1 %v1279_v53  ;;  %v1433_v59 = vshrl.u32 %v471_v28, 7 }
  0x42   : > { %v433_v60 = vadd.f32 %v429_v40, %v409_v50  ;;  %v378_v61 = vrot.slane %v370_v52, 1  ;;  %v398_v62 = vrot.slane %v390_v54, 2  ;;  %v1435_v63 = vadd.f32 %v304_v47, %v296_v55 }
  0x43   : > { %v436_v58 = vmul.f32 %v434_v38, %v431_v49  ;;  %v380_v0 = vrot.slane %v372_v56, 1  ;;  %v400_v1 = vrot.slane %v392_v57, 2  ;;  %v426_v5 = vmul.f32 %v425_v27, %v310_v51 }
  0x44   : > { %v438_v3 = vmul.f32 %v434_v38, %v433_v60  ;;  %v386_v4 = vadd.f32 %v378_v61, %v370_v52  ;;  %v428_v7 = vmul.f32 %v425_v27, %v1435_v63  ;;  %v314_v11 = vrot.slane %v274_v31, 2 }
  0x45   : > { %v456_v2 = vadd.f32 1.0, %v436_v58  ;;  %v388_v6 = vadd.f32 %v380_v0, %v372_v56  ;;  %v473_v14 = vadd.s32 8, %v1433_v59  ;;  %v1440_v17 = vsub.s32 6, %v1433_v59 }
  0x46   : > { %v458_v15 = vadd.f32 1.0, %v438_v3  ;;  %v406_v16 = vadd.f32 %v398_v62, %v386_v4  ;;  %v322_v19 = vmul.f32 %v314_v11, %v274_v31  ;;  %v342_v20 = vmul.f32 %v314_v11, %v1402_v22 }
  0x47   : > { %v460_v12 = vmul.f32 16.0, %v456_v2  ;;  %v408_v18 = vadd.f32 %v400_v1, %v388_v6  ;;  %v1444_v26 = vstv %s1425_s21  ;;  %v1447_v27 = vcvt.s32.f32 %v1433_v59 }
  0x48   : > { %v462_v24 = vmul.f32 16.0, %v458_v15  ;;  %v430_v25 = vadd.f32 %v426_v5, %v406_v16  ;;  %v330_v32 = vrot.slane %v322_v19, 1  ;;  %v350_v33 = vrot.slane %v342_v20, 2 }
  0x49   : > { %v1121_v21 = vadd.f32 -1.0, %v460_v12  ;;  %v432_v30 = vadd.f32 %v428_v7, %v408_v18  ;;  %v1449_v35 = vcvt.s32.f32 %v473_v14  ;;  %v411_v42 = vmul.f32 %v1444_v26, %v310_v51 }
  0x4a   : > { %v1123_v39 = vadd.f32 -1.0, %v462_v24  ;;  %v435_v40 = vmul.f32 %v434_v38, %v430_v25  ;;  %v338_v41 = vadd.f32 %v330_v32, %v322_v19  ;;  %v1454_v48 = vstv %s1377_s19 }
  0x4b   : > { %v468_v34 = vmul.f32 0.5, %v1121_v21  ;;  %v437_v31 = vmul.f32 %v434_v38, %v432_v30  ;;  %vm597_vm0 = vcmask 130048   ;;  %vm767_vm4 = vcmask 392192  }
  0x4c   : > { %v470_v44 = vmul.f32 0.5, %v1123_v39  ;;  %v455_v45 = vadd.f32 1.0, %v435_v40  ;;  %v358_v47 = vadd.f32 %v350_v33, %v338_v41 }
  0x4d   : > { %v483_v43 = vrot.slane %v468_v34, %v1440_v17  ;;  %v457_v46 = vadd.f32 1.0, %v437_v31 }
  0x4e   : > { %v491_v52 = vrot.slane %v470_v44, %v1440_v17  ;;  %v459_v54 = vmul.f32 16.0, %v455_v45  ;;  %v415_v38 = vadd.f32 %v411_v42, %v358_v47 }
  0x4f   : > { %v493_v49 = vsub.f32 %v483_v43, %v1447_v27  ;;  %v497_v50 = vsub.f32 %v483_v43, %v1449_v35  ;;  %v461_v55 = vmul.f32 16.0, %v457_v46 }
  0x50   : > { %v495_v51 = vsub.f32 %v491_v52, %v1447_v27  ;;  %v499_v58 = vsub.f32 %v491_v52, %v1449_v35  ;;  %v1120_v60 = vadd.f32 -1.0, %v459_v54  ;;  %v1462_v62 = vmul.f32 %v1454_v48, %v415_v38  ;;  %v1217_v52 = vld [vmem:[%s1575_s2 + $0x8] sm:$0xff]   ;;  %v1218_v54 = vld [vmem:[%s1575_s2 + $0x10] sm:$0xff]  }
  0x51   : > { %v501_v56 = vand.u32 2147483647, %v493_v49  ;;  %v505_v57 = vand.u32 2147483647, %v497_v50  ;;  %v1122_v61 = vadd.f32 -1.0, %v461_v55  ;;  %v1216_v50 = vld [vmem:[%s1575_s2] sm:$0xff]  }
  0x52   : > { %v503_v2 = vand.u32 2147483647, %v495_v51  ;;  %v507_v3 = vand.u32 2147483647, %v499_v58  ;;  %v467_v4 = vmul.f32 0.5, %v1120_v60  ;;  %v1280_v55 = vmov 0.0  }
  0x53   : > { %v509_v0 = vsub.f32 1.0, %v501_v56  ;;  %v513_v1 = vsub.f32 1.0, %v505_v57  ;;  %v469_v5 = vmul.f32 0.5, %v1122_v61  ;;  %v316_v38 = vrot.slane %v1414_v36, 2 }
  0x54   : > { %v511_v11 = vsub.f32 1.0, %v503_v2  ;;  %v515_v12 = vsub.f32 1.0, %v507_v3  ;;  %v479_v14 = vrot.slane %v467_v4, %v1440_v17  ;;  %v315_v56 = vrot.slane %v1380_v8, 2 }
  0x55   : > { %v517_v6 = vmax.f32 %v509_v0, 0.0  ;;  %v521_v7 = vmax.f32 %v513_v1, 0.0  ;;  %v487_v15 = vrot.slane %v469_v5, %v1440_v17  ;;  %v317_v57 = vrot.slane %v1383_v9, 2 }
  0x56   : > { %v519_v18 = vmax.f32 %v511_v11, 0.0  ;;  %v523_v19 = vmax.f32 %v515_v12, 0.0  ;;  %v492_v20 = vsub.f32 %v479_v14, %v1447_v27  ;;  %v496_v21 = vsub.f32 %v479_v14, %v1449_v35 }
  0x57   : > { %v525_v16 = vpack.c.bf16 %v521_v7, %v517_v6  ;;  %v494_v24 = vsub.f32 %v487_v15, %v1447_v27  ;;  %v498_v25 = vsub.f32 %v487_v15, %v1449_v35  ;;  %v324_v51 = vmul.f32 %v316_v38, %v1414_v36 }
  0x58   : > { %v527_v30 = vpack.c.bf16 %v523_v19, %v519_v18  ;;  %v500_v32 = vand.u32 2147483647, %v492_v20  ;;  %v504_v33 = vand.u32 2147483647, %v496_v21  ;;  %v325_v58 = vmul.f32 %v317_v57, %v1383_v9 }
  0x59   : > { %607 = vmatprep.subr.bf16.mxu0 %v525_v16  ;;  %v502_v34 = vand.u32 2147483647, %v494_v24  ;;  %v506_v39 = vand.u32 2147483647, %v498_v25  ;;  %v332_v60 = vrot.slane %v324_v51, 1  ;;  %v344_v61 = vmul.f32 %v316_v38, %v1417_v37 }
  0x5a   : > { %670 = vmatprep.subr.bf16.mxu1 %v527_v30  ;;  %v508_v40 = vsub.f32 1.0, %v500_v32  ;;  %v512_v31 = vsub.f32 1.0, %v504_v33  ;;  %v343_v1 = vmul.f32 %v315_v56, %v1386_v10  ;;  %v333_v2 = vrot.slane %v325_v58, 1 }
  0x5b   : > { %v510_v41 = vsub.f32 1.0, %v502_v34  ;;  %v514_v42 = vsub.f32 1.0, %v506_v39  ;;  %v345_v3 = vmul.f32 %v317_v57, %v1391_v13  ;;  %v340_v4 = vadd.f32 %v332_v60, %v324_v51 }
  0x5c   : > { %v516_v43 = vmax.f32 %v508_v40, 0.0  ;;  %v520_v44 = vmax.f32 %v512_v31, 0.0  ;;  %v352_v5 = vrot.slane %v344_v61, 2  ;;  %v351_v7 = vrot.slane %v343_v1, 2 }
  0x5d   : > { %v518_v45 = vmax.f32 %v510_v41, 0.0  ;;  %v522_v46 = vmax.f32 %v514_v42, 0.0  ;;  %v341_v11 = vadd.f32 %v333_v2, %v325_v58  ;;  %v353_v12 = vrot.slane %v345_v3, 2 }
  0x5e   : > { %v524_v47 = vpack.c.bf16 %v520_v44, %v516_v43  ;;  %v360_v36 = vadd.f32 %v352_v5, %v340_v4  ;;  %v412_v14 = vmul.f32 %v1444_v26, %v1404_v23  ;;  %v414_v16 = vmul.f32 %v1444_v26, %v1408_v29 }
  0x5f   : > { %v526_v49 = vpack.c.bf16 %v522_v46, %v518_v45  ;;  %v361_v15 = vadd.f32 %v353_v12, %v341_v11  ;;  %v439_v30 = vadd.f32 1.0, %v1462_v62 }
  0x60   : > { %608 = vmatpush1.bf16.msra.mxu0 %v524_v47 }
  0x61   : > { %671 = vmatpush1.bf16.msra.mxu1 %v526_v49  ;;  %v418_v20 = vadd.f32 %v414_v16, %v361_v15  ;;  %v443_v34 = vmul.f32 16.0, %v439_v30 }
  0x63   : > { %1127 = vmatmul.mubr.msk.bf16.vlgmr.msra.gmra.mrb[0].mxu0 %vm597_vm0, %v1216_v50  ;;  %v423_v25 = vmul.f32 %v1454_v48, %v418_v20  ;;  %v1116_v31 = vadd.f32 -1.0, %v443_v34 }
  0x64   : > { %1130 = vmatmul.mubr.msk.bf16.vlgmr.msra.gmra.mrb[0].mxu1 %vm597_vm0, %v1216_v50  ;;  %649 = vmatprep.mubr.bf16.mxu0 %v1279_v53 }
  0x65   : > { %712 = vmatprep.mubr.bf16.mxu1 %v1279_v53  ;;  %v442_v33 = vadd.f32 1.0, %v423_v25  ;;  %v451_v42 = vmul.f32 0.5, %v1116_v31 }
  0x67   : > { %v446_v40 = vmul.f32 16.0, %v442_v33  ;;  %v531_v46 = vrot.slane %v451_v42, %v1440_v17 }
  0x69   : > { %v1119_v41 = vadd.f32 -1.0, %v446_v40  ;;  %v544_v49 = vsub.f32 %v531_v46, %v1447_v27  ;;  %v548_v38 = vsub.f32 %v531_v46, %v1449_v35 }
  0x6b   : > { %1128 = vmatmul.mubr.msk.bf16.gmra.mrb[4].mxu0 %vm597_vm0, %v1217_v52  ;;  %v454_v45 = vmul.f32 0.5, %v1119_v41  ;;  %v552_v51 = vand.u32 2147483647, %v544_v49  ;;  %v556_v61 = vand.u32 2147483647, %v548_v38 }
  0x6c   : > { %1131 = vmatmul.mubr.msk.bf16.gmra.mrb[4].mxu1 %vm597_vm0, %v1217_v52  ;;  %659 = vmatprep.mubr.bf16.mxu0 %v1279_v53 }
  0x6d   : > { %722 = vmatprep.mubr.bf16.mxu1 %v1279_v53  ;;  %v323_v53 = vmul.f32 %v315_v56, %v1380_v8  ;;  %v413_v8 = vmul.f32 %v1444_v26, %v1435_v63  ;;  %v543_v47 = vrot.slane %v454_v45, %v1440_v17  ;;  %v560_v2 = vsub.f32 1.0, %v552_v51 }
  0x6e   : > { %v761_v51 = vadd.s32 1, %v1433_v59 }
  0x6f   : > { %v331_v0 = vrot.slane %v323_v53, 1  ;;  %v417_v18 = vadd.f32 %v413_v8, %v360_v36  ;;  %v568_v12 = vmax.f32 %v560_v2, 0.0 }
  0x71   : > { %v339_v6 = vadd.f32 %v331_v0, %v323_v53  ;;  %v422_v21 = vmul.f32 %v1454_v48, %v417_v18  ;;  %v551_v53 = vsub.f32 %v543_v47, %v1449_v35 }
  0x73   : > { %1129 = vmatmul.mubr.msk.bf16.gmra.mrb[8].mxu0 %vm597_vm0, %v1218_v54  ;;  %v359_v9 = vadd.f32 %v351_v7, %v339_v6  ;;  %v441_v63 = vadd.f32 1.0, %v422_v21  ;;  %v559_v3 = vand.u32 2147483647, %v551_v53  ;;  %v564_v6 = vsub.f32 1.0, %v556_v61 }
  0x74   : > { %1132 = vmatmul.mubr.msk.bf16.gmra.mrb[8].mxu1 %vm597_vm0, %v1218_v54  ;;  %835 = vmatprep.mubr.f32.mxu0 %v1280_v55  ;;  %v547_v54 = vsub.f32 %v543_v47, %v1447_v27 }
  0x75   : > { %906 = vmatprep.mubr.f32.mxu1 %v1280_v55  ;;  %v416_v19 = vadd.f32 %v412_v14, %v359_v9  ;;  %v445_v23 = vmul.f32 16.0, %v441_v63  ;;  %v567_v36 = vsub.f32 1.0, %v559_v3  ;;  %v758_v3 = vand.u32 127, %v471_v28 }
  0x77   : > { %v421_v24 = vmul.f32 %v1454_v48, %v416_v19  ;;  %v1118_v29 = vadd.f32 -1.0, %v445_v23 }
  0x79   : > { %v440_v32 = vadd.f32 1.0, %v421_v24  ;;  %v453_v43 = vmul.f32 0.5, %v1118_v29  ;;  %v1524_v24 = vmax.f32 %v567_v36, 0.0 }
  0x7b   : > { %v444_v39 = vmul.f32 16.0, %v440_v32  ;;  %v539_v48 = vrot.slane %v453_v43, %v1440_v17 }
  0x7d   : > { %v1117_v26 = vadd.f32 -1.0, %v444_v39  ;;  %v546_v50 = vsub.f32 %v539_v48, %v1447_v27  ;;  %v550_v56 = vsub.f32 %v539_v48, %v1449_v35 }
  0x7f   : > { %v452_v44 = vmul.f32 0.5, %v1117_v26  ;;  %v554_v58 = vand.u32 2147483647, %v546_v50  ;;  %v558_v0 = vand.u32 2147483647, %v550_v56 }
  0x81   : > { %v535_v62 = vrot.slane %v452_v44, %v1440_v17  ;;  %v555_v17 = vand.u32 2147483647, %v547_v54  ;;  %v562_v4 = vsub.f32 1.0, %v554_v58  ;;  %v566_v7 = vsub.f32 1.0, %v558_v0 }
  0x83   : > { %v545_v52 = vsub.f32 %v535_v62, %v1447_v27  ;;  %v549_v57 = vsub.f32 %v535_v62, %v1449_v35  ;;  %v563_v27 = vsub.f32 1.0, %v555_v17  ;;  %v570_v8 = vmax.f32 %v562_v4, 0.0 }
  0x84   : > { %v1518_v35 = vmax.f32 %v564_v6, 0.0  ;;  %v1520_v16 = vmax.f32 %v566_v7, 0.0  ;;  %v759_v4 = vmul.u32 16, %v1433_v59 }
  0x85   : > { %v553_v60 = vand.u32 2147483647, %v545_v52  ;;  %v557_v1 = vand.u32 2147483647, %v549_v57  ;;  %v1516_v14 = vmax.f32 %v563_v27, 0.0 }
  0x86   : > { %vm760_vm1 = vcmp.ge.s32.totalorder %v758_v3, %v759_v4 }
  0x87   : > { %v561_v5 = vsub.f32 1.0, %v553_v60  ;;  %v565_v11 = vsub.f32 1.0, %v557_v1 }
  0x89   : > { %v569_v9 = vmax.f32 %v561_v5, 0.0  ;;  %v1522_v18 = vmax.f32 %v565_v11, 0.0  ;;  %v762_v5 = vmul.u32 16, %v761_v51 }
  0x8b   : > { %vm763_vm2 = vcmp.lt.s32.totalorder %v758_v3, %v762_v5 }
  0x8c   : > { %vm764_vm3 = vmand %vm760_vm1, %vm763_vm2 }
 0x136   : > { %v641_v15 = vpop.f32.mrb[0].mxu0 }
 0x137   : > { %v733_v19 = vmul.f32 %v641_v15, %v568_v12  ;;  %v704_v20 = vpop.f32.mrb[0].mxu1  ;;  %v643_v21 = vpop.f32.mrb[1].mxu0 }
 0x138   : > { %v735_v25 = vmul.f32 %v704_v20, %v570_v8  ;;  %v734_v30 = vmul.f32 %v643_v21, %v569_v9  ;;  %v706_v63 = vpop.f32.mrb[1].mxu1  ;;  %v645_v32 = vpop.f32.mrb[2].mxu0 }
 0x139   : > { %v736_v33 = vmul.f32 %v706_v63, %v1516_v14  ;;  %v737_v34 = vmul.f32 %v645_v32, %v1518_v35  ;;  %v708_v23 = vpop.f32.mrb[2].mxu1  ;;  %v647_v39 = vpop.f32.mrb[3].mxu0 }
 0x13a   : > { %v739_v40 = vmul.f32 %v708_v23, %v1520_v16  ;;  %v738_v31 = vmul.f32 %v647_v39, %v1522_v18  ;;  %v710_v29 = vpop.f32.mrb[3].mxu1  ;;  %v936_v39 = vsub.f32 1.0, %v1391_v13 }
 0x13b   : > { %v1141_v26 = vpack.c.bf16 %v737_v34, %v733_v19  ;;  %v740_v41 = vmul.f32 %v710_v29, %v1524_v24 }
 0x13c   : > { %v1153_v42 = vpack.c.bf16 %v739_v40, %v735_v25  ;;  %v1139_v43 = vpack.c.bf16 %v738_v31, %v734_v30 }
 0x13d   : > { %v1151_v44 = vpack.c.bf16 %v740_v41, %v736_v33 }
 0x13e   : > { %v651_v45 = vpop.f32.mrb[4].mxu0  ;;  %1140 = vmatprep.subr.bf16.mxu0 %v1139_v43 }
 0x13f   : > { %v741_v46 = vmul.f32 %v651_v45, %v568_v12  ;;  %v714_v48 = vpop.f32.mrb[4].mxu1  ;;  %1152 = vmatprep.subr.bf16.mxu1 %v1151_v44  ;;  %v653_v62 = vpop.f32.mrb[5].mxu0  ;;  %1142 = vmatpush1.bf16.msra.mxu0 %v1141_v26 }
 0x140   : > { %v743_v47 = vmul.f32 %v714_v48, %v570_v8  ;;  %v742_v49 = vmul.f32 %v653_v62, %v569_v9  ;;  %v716_v50 = vpop.f32.mrb[5].mxu1  ;;  %1154 = vmatpush1.bf16.msra.mxu1 %v1153_v42  ;;  %v655_v52 = vpop.f32.mrb[6].mxu0 }
 0x141   : > { %v744_v54 = vmul.f32 %v716_v50, %v1516_v14  ;;  %v745_v38 = vmul.f32 %v655_v52, %v1518_v35  ;;  %v718_v56 = vpop.f32.mrb[6].mxu1  ;;  %v657_v57 = vpop.f32.mrb[7].mxu0 }
 0x142   : > { %v747_v53 = vmul.f32 %v718_v56, %v1520_v16  ;;  %v746_v58 = vmul.f32 %v657_v57, %v1522_v18  ;;  %v720_v60 = vpop.f32.mrb[7].mxu1 }
 0x143   : > { %v1145_v17 = vpack.c.bf16 %v745_v38, %v741_v46  ;;  %v748_v61 = vmul.f32 %v720_v60, %v1524_v24 }
 0x144   : > { %v1157_v0 = vpack.c.bf16 %v747_v53, %v743_v47  ;;  %v1143_v1 = vpack.c.bf16 %v746_v58, %v742_v49 }
 0x145   : > { %v1155_v2 = vpack.c.bf16 %v748_v61, %v744_v54 }
 0x146   : > { %v661_v27 = vpop.f32.mrb[8].mxu0  ;;  %1144 = vmatprep.subr.bf16.mxu0 %v1143_v1 }
 0x147   : > { %v749_v6 = vmul.f32 %v661_v27, %v568_v12  ;;  %v724_v7 = vpop.f32.mrb[8].mxu1  ;;  %1156 = vmatprep.subr.bf16.mxu1 %v1155_v2  ;;  %v663_v11 = vpop.f32.mrb[9].mxu0  ;;  %1146 = vmatpush1.bf16.msra.mxu0 %v1145_v17 }
 0x148   : > { %v751_v36 = vmul.f32 %v724_v7, %v570_v8  ;;  %v750_v15 = vmul.f32 %v663_v11, %v569_v9  ;;  %v726_v19 = vpop.f32.mrb[9].mxu1  ;;  %1158 = vmatpush1.bf16.msra.mxu1 %v1157_v0  ;;  %v665_v20 = vpop.f32.mrb[10].mxu0 }
 0x149   : > { %v752_v21 = vmul.f32 %v726_v19, %v1516_v14  ;;  %v753_v25 = vmul.f32 %v665_v20, %v1518_v35  ;;  %v728_v28 = vpop.f32.mrb[10].mxu1  ;;  %v667_v30 = vpop.f32.mrb[11].mxu0  ;;  %v1133_v14 = vsel %vm764_vm3, 1.0, %v1280_v55  ;;  %v933_v35 = vsub.f32 1.0, %v1402_v22 }
 0x14a   : > { %v755_v63 = vmul.f32 %v728_v28, %v1520_v16  ;;  %v754_v12 = vmul.f32 %v667_v30, %v1522_v18  ;;  %v730_v32 = vpop.f32.mrb[11].mxu1  ;;  %v934_v16 = vsub.f32 1.0, %v1386_v10  ;;  %v935_v18 = vsub.f32 1.0, %v1417_v37 }
 0x14b   : > { %v1149_v33 = vpack.c.bf16 %v753_v25, %v749_v6  ;;  %v756_v8 = vmul.f32 %v730_v32, %v1524_v24  ;;  %v915_v24 = vsub.s32 1, %v1433_v59  ;;  %v937_v40 = vmul.f32 0.7, %v933_v35 }
 0x14c   : > { %v1161_v9 = vpack.c.bf16 %v755_v63, %v751_v36  ;;  %v1147_v34 = vpack.c.bf16 %v754_v12, %v750_v15  ;;  %v938_v31 = vmul.f32 0.7, %v934_v16  ;;  %v939_v29 = vmul.f32 0.7, %v935_v18 }
 0x14d   : > { %v1159_v23 = vpack.c.bf16 %v756_v8, %v752_v21  ;;  %v916_v26 = vrot.slane %v1402_v22, %v915_v24  ;;  %v940_v55 = vmul.f32 0.7, %v936_v39  ;;  %v920_v41 = vrot.slane %v1386_v10, %v915_v24 }
 0x14e   : > { %1148 = vmatprep.subr.bf16.mxu0 %v1147_v34  ;;  %v924_v42 = vrot.slane %v1417_v37, %v915_v24  ;;  %v944_v43 = vrot.slane %v937_v40, %v915_v24  ;;  %v928_v44 = vrot.slane %v1391_v13, %v915_v24  ;;  %v948_v46 = vrot.slane %v938_v31, %v915_v24 }
 0x14f   : > { %1160 = vmatprep.subr.bf16.mxu1 %v1159_v23  ;;  %1150 = vmatpush1.bf16.msra.mxu0 %v1149_v33  ;;  %v952_v59 = vrot.slane %v939_v29, %v915_v24  ;;  %v956_v49 = vrot.slane %v940_v55, %v915_v24 }
 0x150   : > { %1162 = vmatpush1.bf16.msra.mxu1 %v1161_v9 }
 0x152   : > { %1134 = vmatmul.mubr.msk.f32.vlgmr.msra.gmra.mrb[12].mxu0 %vm767_vm4, %v1133_v14 }
 0x153   : > { %1135 = vmatmul.mubr.msk.f32.vlgmr.msra.gmra.mrb[12].mxu1 %vm767_vm4, %v1133_v14 }
 0x225   : > { %v837_v45 = vpop.f32.mrb[12].mxu0 }
 0x226   : > { %v929_v48 = vmul.f32 %v916_v26, %v837_v45  ;;  %v839_v62 = vpop.f32.mrb[13].mxu0  ;;  %v908_v47 = vpop.f32.mrb[12].mxu1 }
 0x227   : > { %v930_v50 = vmul.f32 %v920_v41, %v839_v62  ;;  %v931_v52 = vmul.f32 %v924_v42, %v908_v47  ;;  %v910_v22 = vpop.f32.mrb[13].mxu1 }
 0x228   : > { %v957_v54 = vadd.f32 %v944_v43, %v929_v48  ;;  %v932_v38 = vmul.f32 %v928_v44, %v910_v22 }
 0x229   : > { %v958_v10 = vadd.f32 %v948_v46, %v930_v50  ;;  %v959_v56 = vadd.f32 %v952_v59, %v931_v52 }
 0x22a   : > { %v961_v37 = vmul.f32 255.0, %v957_v54  ;;  %v960_v57 = vadd.f32 %v956_v49, %v932_v38 }
 0x22b   : > { %v962_v51 = vmul.f32 255.0, %v958_v10  ;;  %v963_v13 = vmul.f32 255.0, %v959_v56 }
 0x22c   : > { %v965_v53 = vmax.f32 %v961_v37, 0.0  ;;  %v964_v58 = vmul.f32 255.0, %v960_v57 }
 0x22d   : > { %v966_v60 = vmax.f32 %v962_v51, 0.0  ;;  %v967_v17 = vmax.f32 %v963_v13, 0.0 }
 0x22e   : > { %v969_v61 = vmin.f32 %v965_v53, 255.0  ;;  %v968_v0 = vmax.f32 %v964_v58, 0.0 }
 0x22f   : > { %v970_v1 = vmin.f32 %v966_v60, 255.0  ;;  %v971_v2 = vmin.f32 %v967_v17, 255.0 }
 0x230   : > { %v972_v3 = vmin.f32 %v968_v0, 255.0 }
 0x231   : > { %v977_v4 = vcombine.low %v969_v61, %v970_v1 }
 0x232   : > { %v978_v5 = vcombine.low %v971_v2, %v972_v3 }
 0x233   : > { %981 = vst [vmem:[%s265_s5] sm:$0x77] %v977_v4 }
 0x234   : > { %982 = vst [vmem:[%s265_s5 + $0x8] sm:$0x77] %v978_v5 }
 0x235 PF: > { %s14_s16 = sadd.s32 1, %s1276_s16   ;;  %s1580_s12 = smov %s1264_s13 }
 0x236   : > { %p11_p7 = scmp.ge.s32.totalorder %s14_s16, 4   ;;  %s1581_s13 = smov %s1351_s24 }
 0x237   : > { %s1582_s14 = smov %s1272_s15  ;;  %s1583_s15 = smov %s1585_s18 }
 0x238   :  { %13 = sbr.rel (!%p11_p7) target bundleno = 3 (0x3), region = 98 }
 0x23f   :  { %1013 = vsyncpa [#allocation3], 1 }
 0x240   :  { %1015 = vsyncpa [#allocation3 + $0x1], 1 }

</bundles_post_ra>
